<compile_context>
chip_gen: v5e
topology: v5e:2x2
jax: 0.10.0
libtpu: 0.0.40
codegen_flags: <defaults>
</compile_context>

<pallas_src>
import math

import jax
import jax.numpy as jnp
from jax import lax
from jax.experimental import pallas as pl
from jax.experimental.pallas import tpu as pltpu

_MiB = 1024 * 1024


def _round_up(x, m):
    return ((x + m - 1) // m) * m


def _hw_params():
    """(vmem_capacity_bytes, tensorcores_per_chip) with safe fallbacks."""
    vmem_cap = 64 * _MiB          # conservative default: v7x per-TensorCore VMEM
    n_cores = 0
    try:
        info = pltpu.get_tpu_info()
        vmem_cap = int(getattr(info, "vmem_capacity_bytes", vmem_cap))
        n_cores = int(getattr(info, "num_tensorcores",
                              getattr(info, "tensorcores_per_chip", 0)) or 0)
    except Exception:
        pass
    if n_cores <= 0:
        # Heuristic: 64 MiB/TC parts (v7x) pair two TensorCores per chip.
        n_cores = 2 if vmem_cap <= 64 * _MiB else 1
    return vmem_cap, n_cores


def _pick_tile_h(hidden, max_tile_h):
    """Hidden-dim (reduction) chunk: full hidden if it fits, else the largest
    chunk <= max_tile_h, preferring 256-aligned chunks (256x256 MXU on v6e/v7x)
    that divide hidden exactly (no weight padding)."""
    if hidden <= max_tile_h:
        return hidden
    top256 = max_tile_h - (max_tile_h % 256)
    for cand in range(top256, 255, -256):
        if hidden % cand == 0:
            return cand
    top128 = max_tile_h - (max_tile_h % 128)
    for cand in range(top128, 127, -128):
        if hidden % cand == 0:
            return cand
    # No clean divisor: take the biggest aligned chunk; hidden gets zero-padded.
    return max(top256, 256) if top256 >= 256 else max(top128, 128)


def _ffn_kernel(x_ref, w1_ref, b1_ref, w2_ref, b2_ref, o_ref, acc_ref):
    k = pl.program_id(1)

    @pl.when(k == 0)
    def _init():
        acc_ref[...] = jnp.zeros_like(acc_ref)

    # First linear chunk: (tile_t, dim) @ (dim, tile_h), f32 accumulate on the MXU.
    # Operands stay in their native dtype (bf16 feeds the MXU directly).
    h = jnp.dot(x_ref[...], w1_ref[...], preferred_element_type=jnp.float32)
    h = h + b1_ref[...].astype(jnp.float32)

    # Exact-erf GeLU in f32: x * 0.5 * (1 + erf(x / sqrt(2)))
    h = h * (0.5 * (1.0 + lax.erf(h * (1.0 / math.sqrt(2.0)))))

    # Dropout(p=0.0) is the identity -- nothing to do.
    # TODO(synk): dropout with p>0 at train time would need pltpu.prng_* masking.

    # Second linear chunk: (tile_t, tile_h) @ (tile_h, out_dim_p), f32 accumulate.
    acc_ref[...] += jnp.dot(h.astype(w2_ref.dtype), w2_ref[...],
                            preferred_element_type=jnp.float32)

    @pl.when(k == pl.num_programs(1) - 1)
    def _finalize():
        o_ref[...] = (acc_ref[...] + b2_ref[...].astype(jnp.float32)).astype(o_ref.dtype)


def feed_forward(x, w1, b1, w2, b2, *, max_tile_t=1024, max_tile_h=512,
                 vmem_limit_bytes=None):
    """x: (..., dim). w1: (dim, hidden), w2: (hidden, out_dim). Returns (..., out_dim)."""
    dim, hidden = w1.shape
    out_dim = w2.shape[1]
    assert x.shape[-1] == dim
    assert w2.shape[0] == hidden
    assert b1.shape == (hidden,) and b2.shape == (out_dim,)

    lead = x.shape[:-1]
    tokens = math.prod(lead) if lead else 1
    x2d = x.reshape(tokens, dim)

    x_itemsize = x.dtype.itemsize
    w_itemsize = w1.dtype.itemsize

    # --- hardware-aware budgets --------------------------------------------
    vmem_cap, n_cores = _hw_params()
    budget = int(vmem_cap * 0.75)          # leave headroom for compiler scratch

    # --- lane-dense output: pad out_dim up to a multiple of 128.
    # (Real transformer widths are already 256-aligned; forcing 256 here would
    #  add up to 33% padded HBM traffic for e.g. out_dim=384, so keep 128.)
    out_dim_p = _round_up(out_dim, 128)

    # --- hidden (reduction) tiling, capped so the double-buffered W1+W2 chunks
    #     stay under ~1/3 of the budget (drives tile_h down to 256 on v7x/f32/4k).
    w_bytes_per_h = 2 * (dim + out_dim_p) * w_itemsize
    fit_h = max(128, ((budget // 3) // max(1, w_bytes_per_h)) // 128 * 128)
    tile_h = _pick_tile_h(hidden, min(max_tile_h, fit_h))
    hidden_p = _round_up(hidden, tile_h)
    if hidden_p != hidden:
        ph = hidden_p - hidden
        w1 = jnp.pad(w1, ((0, 0), (0, ph)))
        b1 = jnp.pad(b1, ((0, ph),))
        w2 = jnp.pad(w2, ((0, ph), (0, 0)))
    grid_h = hidden_p // tile_h

    if out_dim_p != out_dim:
        pn = out_dim_p - out_dim
        w2 = jnp.pad(w2, ((0, 0), (0, pn)))
        b2 = jnp.pad(b2, ((0, pn),))

    # --- token tiling --------------------------------------------------------
    # Sublane packing: f32 -> rows of 8, bf16 -> 16, int8/fp8 -> 32.
    sub = 8 * max(1, 4 // x_itemsize)
    tokens_p = _round_up(max(tokens, 1), sub)

    # Largest token tile that fits next to the weight chunks + f32 accumulator.
    fixed = (2 * dim * tile_h * w_itemsize              # w1 blocks (double-buffered)
             + 2 * tile_h * out_dim_p * w_itemsize      # w2 blocks
             + 2 * 8 * tile_h * b1.dtype.itemsize       # b1 blocks (sublane-padded)
             + 2 * 8 * out_dim_p * b2.dtype.itemsize)   # b2 blocks
    per_row = (2 * dim + 2 * out_dim_p) * x_itemsize + out_dim_p * 4
    tile_t_cap = max(sub, min(max_tile_t, (budget - fixed) // per_row) // sub * sub)

    # Split tokens into near-equal, full (unmasked) tiles; guarantee at least one
    # tile per TensorCore on multi-core parts so both v7x cores stay busy.
    n_t = pl.cdiv(tokens_p, tile_t_cap)
    if n_cores > 1 and tokens_p >= n_cores * sub:
        n_t = max(n_t, n_cores)
    tile_t = min(tile_t_cap, _round_up(pl.cdiv(tokens_p, n_t), sub))
    tokens_pad = n_t * tile_t
    if tokens_pad != tokens:
        x2d = jnp.pad(x2d, ((0, tokens_pad - tokens), (0, 0)))

    b1_2d = b1.reshape(1, hidden_p)
    b2_2d = b2.reshape(1, out_dim_p)

    # --- scoped-VMEM limit from the actual tile footprint --------------------
    footprint = (2 * tile_t * dim * x_itemsize            # x blocks
                 + 2 * tile_t * out_dim_p * x_itemsize    # out blocks
                 + tile_t * out_dim_p * 4                 # f32 accumulator
                 + fixed)
    if vmem_limit_bytes is None:
        vmem_limit_bytes = min(int(vmem_cap), max(footprint + 8 * _MiB, 32 * _MiB))

    # --- scheduler hint: weights are re-streamed once per token tile ---------
    cost = pl.CostEstimate(
        flops=2 * tokens * dim * hidden + 2 * tokens * hidden * out_dim,
        transcendentals=tokens * hidden,
        bytes_accessed=(tokens_pad * dim * x_itemsize
                        + tokens_pad * out_dim_p * x_itemsize
                        + n_t * (w1.size * w_itemsize + w2.size * w_itemsize
                                 + b1_2d.size * b1.dtype.itemsize
                                 + b2_2d.size * b2.dtype.itemsize)),
    )

    out2d = pl.pallas_call(
        _ffn_kernel,
        out_shape=jax.ShapeDtypeStruct((tokens_pad, out_dim_p), x.dtype),
        grid_spec=pltpu.PrefetchScalarGridSpec(
            num_scalar_prefetch=0,
            grid=(n_t, grid_h),
            in_specs=[
                pl.BlockSpec((tile_t, dim), lambda i, k: (i, 0)),
                pl.BlockSpec((dim, tile_h), lambda i, k: (0, k)),
                pl.BlockSpec((1, tile_h), lambda i, k: (0, k)),
                pl.BlockSpec((tile_h, out_dim_p), lambda i, k: (k, 0)),
                pl.BlockSpec((1, out_dim_p), lambda i, k: (0, 0)),
            ],
            out_specs=pl.BlockSpec((tile_t, out_dim_p), lambda i, k: (i, 0)),
            scratch_shapes=[pltpu.VMEM((tile_t, out_dim_p), jnp.float32)],
        ),
        compiler_params=pltpu.CompilerParams(
            dimension_semantics=("parallel", "arbitrary"),
            vmem_limit_bytes=int(vmem_limit_bytes)),
        cost_estimate=cost,
    )(x2d, w1, b1_2d, w2, b2_2d)

    out2d = out2d[:tokens, :out_dim]
    return out2d.reshape(*lead, out_dim)


def init_feed_forward_params(key, dim, hidden_dim, out_dim=None,
                             dtype=jnp.float32):
    """Mirrors nn.Linear default init (uniform +-1/sqrt(fan_in)).

    Weights are (in_features, out_features) -- the transpose of PyTorch's
    (out, in) layout -- so the kernel computes x @ W directly.
    """
    if out_dim is None:
        out_dim = dim
    k1, k2, k3, k4 = jax.random.split(key, 4)
    bound1 = 1.0 / math.sqrt(dim)
    bound2 = 1.0 / math.sqrt(hidden_dim)
    w1 = jax.random.uniform(k1, (dim, hidden_dim), dtype, -bound1, bound1)
    b1 = jax.random.uniform(k2, (hidden_dim,), dtype, -bound1, bound1)
    w2 = jax.random.uniform(k3, (hidden_dim, out_dim), dtype, -bound2, bound2)
    b2 = jax.random.uniform(k4, (out_dim,), dtype, -bound2, bound2)
    return w1, b1, w2, b2


def _reference(x, w1, b1, w2, b2):
    h = x.astype(jnp.float32) @ w1.astype(jnp.float32) + b1.astype(jnp.float32)
    h = h * 0.5 * (1.0 + lax.erf(h / math.sqrt(2.0)))
    return (h @ w2.astype(jnp.float32) + b2.astype(jnp.float32)).astype(x.dtype)


if __name__ == "__main__":
    # Small shapes: batch=2, seq=8, dim=32, hidden=64, out_dim=dim.
    batch, seq, dim, hidden_dim = 2, 8, 32, 64

    key = jax.random.PRNGKey(0)
    kx, kp = jax.random.split(key)
    x = jax.random.normal(kx, (batch, seq, dim), jnp.float32)
    w1, b1, w2, b2 = init_feed_forward_params(kp, dim, hidden_dim)

    # f32 path (exact reference).
    out = jax.block_until_ready(feed_forward(x, w1, b1, w2, b2))
    ref = _reference(x, w1, b1, w2, b2)
    assert out.shape == (batch, seq, dim), out.shape
    assert jnp.allclose(out, ref, atol=1e-5, rtol=1e-5), \
        float(jnp.max(jnp.abs(out - ref)))

    # bf16 mixed-precision path (native-dtype MXU feeds, f32 accumulate).
    xb = x.astype(jnp.bfloat16)
    pb = tuple(p.astype(jnp.bfloat16) for p in (w1, b1, w2, b2))
    outb = jax.block_until_ready(feed_forward(xb, *pb))
    refb = _reference(xb, *pb).astype(jnp.float32)
    assert outb.shape == (batch, seq, dim), outb.shape
    assert jnp.allclose(outb.astype(jnp.float32), refb, atol=1e-1, rtol=1e-1), \
        float(jnp.max(jnp.abs(outb.astype(jnp.float32) - refb)))

    print("KERNEL_OK")
</pallas_src>

<mosaic_0001>
module attributes {stable_mosaic.version = 11 : i64} {
  func.func @_ffn_kernel(%arg0: i32, %arg1: i32, %arg2: memref<8x32xf32, #tpu.memory_space<vmem>>, %arg3: memref<32x64xf32, #tpu.memory_space<vmem>>, %arg4: memref<1x64xf32, #tpu.memory_space<vmem>>, %arg5: memref<64x128xf32, #tpu.memory_space<vmem>>, %arg6: memref<1x128xf32, #tpu.memory_space<vmem>>, %arg7: memref<8x128xf32, #tpu.memory_space<vmem>>, %arg8: memref<8x128xf32, #tpu.memory_space<vmem>>) attributes {dimension_semantics = [#tpu.dimension_semantics<parallel>, #tpu.dimension_semantics<arbitrary>], iteration_bounds = array<i64: 2, 1>, scalar_prefetch = 0 : i64, scratch_operands = 1 : i64, tpu.core_type = #tpu.core_type<tc>, window_params = [{transform_indices = @transform_0, window_bounds = array<i64: 8, 32>}, {transform_indices = @transform_1, window_bounds = array<i64: 32, 64>}, {transform_indices = @transform_2, window_bounds = array<i64: 1, 64>}, {transform_indices = @transform_3, window_bounds = array<i64: 64, 128>}, {pipeline_mode = #tpu.pipeline_mode<synchronous>, transform_indices = @transform_4, window_bounds = array<i64: 1, 128>}, {transform_indices = @transform_5, window_bounds = array<i64: 8, 128>}]} {
    %c0_i32 = arith.constant 0 : i32
    %0 = arith.cmpi eq, %arg1, %c0_i32 : i32
    %1 = arith.extui %0 : i1 to i32
    %c0_i32_0 = arith.constant 0 : i32
    %2 = arith.cmpi ne, %1, %c0_i32_0 : i32
    scf.if %2 {
      %cst_18 = arith.constant 0.000000e+00 : f32
      %25 = vector.broadcast %cst_18 : f32 to vector<8x128xf32>
      %c0_19 = arith.constant 0 : index
      %c0_20 = arith.constant 0 : index
      %26 = vector.load %arg8[%c0_19, %c0_20] : memref<8x128xf32, #tpu.memory_space<vmem>>, vector<8x128xf32>
      tpu.vector_store %arg8[%c0_19, %c0_20], %25 {strides = array<i32>} : memref<8x128xf32, #tpu.memory_space<vmem>>, vector<8x128xf32>,
    } else {
    }
    %c0 = arith.constant 0 : index
    %c0_1 = arith.constant 0 : index
    %3 = vector.load %arg2[%c0, %c0_1] : memref<8x32xf32, #tpu.memory_space<vmem>>, vector<8x32xf32>
    %c0_2 = arith.constant 0 : index
    %c0_3 = arith.constant 0 : index
    %4 = vector.load %arg3[%c0_2, %c0_3] : memref<32x64xf32, #tpu.memory_space<vmem>>, vector<32x64xf32>
    %cst = arith.constant dense<0.000000e+00> : vector<8x64xf32>
    %5 = tpu.matmul %3, %4, %cst {dimension_numbers = #tpu.dot_dimension_numbers<[1], [0], [0], [1], [0, 0, 1, 1], [], []>} : vector<8x32xf32>, vector<32x64xf32>, vector<8x64xf32> -> vector<8x64xf32>
    %c0_4 = arith.constant 0 : index
    %c0_5 = arith.constant 0 : index
    %6 = vector.load %arg4[%c0_4, %c0_5] : memref<1x64xf32, #tpu.memory_space<vmem>>, vector<1x64xf32>
    %7 = vector.broadcast %6 : vector<1x64xf32> to vector<8x64xf32>
    %8 = arith.addf %5, %7 : vector<8x64xf32>
    %cst_6 = arith.constant 0.707106769 : f32
    %9 = vector.broadcast %cst_6 : f32 to vector<8x64xf32>
    %10 = arith.mulf %8, %9 : vector<8x64xf32>
    %11 = math.erf %10 : vector<8x64xf32>
    %cst_7 = arith.constant 1.000000e+00 : f32
    %12 = vector.broadcast %cst_7 : f32 to vector<8x64xf32>
    %13 = arith.addf %12, %11 : vector<8x64xf32>
    %cst_8 = arith.constant 5.000000e-01 : f32
    %14 = vector.broadcast %cst_8 : f32 to vector<8x64xf32>
    %15 = arith.mulf %14, %13 : vector<8x64xf32>
    %16 = arith.mulf %8, %15 : vector<8x64xf32>
    %c0_9 = arith.constant 0 : index
    %c0_10 = arith.constant 0 : index
    %17 = vector.load %arg8[%c0_9, %c0_10] : memref<8x128xf32, #tpu.memory_space<vmem>>, vector<8x128xf32>
    %c0_11 = arith.constant 0 : index
    %c0_12 = arith.constant 0 : index
    %18 = vector.load %arg5[%c0_11, %c0_12] : memref<64x128xf32, #tpu.memory_space<vmem>>, vector<64x128xf32>
    %cst_13 = arith.constant dense<0.000000e+00> : vector<8x128xf32>
    %19 = tpu.matmul %16, %18, %cst_13 {dimension_numbers = #tpu.dot_dimension_numbers<[1], [0], [0], [1], [0, 0, 1, 1], [], []>} : vector<8x64xf32>, vector<64x128xf32>, vector<8x128xf32> -> vector<8x128xf32>
    %20 = arith.addf %17, %19 : vector<8x128xf32>
    %c0_14 = arith.constant 0 : index
    %c0_15 = arith.constant 0 : index
    %21 = vector.load %arg8[%c0_14, %c0_15] : memref<8x128xf32, #tpu.memory_space<vmem>>, vector<8x128xf32>
    tpu.vector_store %arg8[%c0_14, %c0_15], %20 {strides = array<i32>} : memref<8x128xf32, #tpu.memory_space<vmem>>, vector<8x128xf32>,
    %c0_i32_16 = arith.constant 0 : i32
    %22 = arith.cmpi eq, %arg1, %c0_i32_16 : i32
    %23 = arith.extui %22 : i1 to i32
    %c0_i32_17 = arith.constant 0 : i32
    %24 = arith.cmpi ne, %23, %c0_i32_17 : i32
    scf.if %24 {
      %c0_18 = arith.constant 0 : index
      %c0_19 = arith.constant 0 : index
      %25 = vector.load %arg8[%c0_18, %c0_19] : memref<8x128xf32, #tpu.memory_space<vmem>>, vector<8x128xf32>
      %c0_20 = arith.constant 0 : index
      %c0_21 = arith.constant 0 : index
      %26 = vector.load %arg6[%c0_20, %c0_21] : memref<1x128xf32, #tpu.memory_space<vmem>>, vector<1x128xf32>
      %27 = vector.broadcast %26 : vector<1x128xf32> to vector<8x128xf32>
      %28 = arith.addf %25, %27 : vector<8x128xf32>
      %c0_22 = arith.constant 0 : index
      %c0_23 = arith.constant 0 : index
      %29 = vector.load %arg7[%c0_22, %c0_23] : memref<8x128xf32, #tpu.memory_space<vmem>>, vector<8x128xf32>
      tpu.vector_store %arg7[%c0_22, %c0_23], %28 {strides = array<i32>} : memref<8x128xf32, #tpu.memory_space<vmem>>, vector<8x128xf32>,
    } else {
    }
    return
  }
  func.func @transform_0(%arg0: i32, %arg1: i32) -> (i32, i32) {
    %c0_i32 = arith.constant 0 : i32
    %c0_i32_0 = arith.constant 0 : i32
    return %arg0, %c0_i32 : i32, i32
  }
  func.func @transform_1(%arg0: i32, %arg1: i32) -> (i32, i32) {
    %c0_i32 = arith.constant 0 : i32
    %c0_i32_0 = arith.constant 0 : i32
    return %c0_i32, %arg1 : i32, i32
  }
  func.func @transform_2(%arg0: i32, %arg1: i32) -> (i32, i32) {
    %c0_i32 = arith.constant 0 : i32
    %c0_i32_0 = arith.constant 0 : i32
    return %c0_i32, %arg1 : i32, i32
  }
  func.func @transform_3(%arg0: i32, %arg1: i32) -> (i32, i32) {
    %c0_i32 = arith.constant 0 : i32
    %c0_i32_0 = arith.constant 0 : i32
    return %arg1, %c0_i32 : i32, i32
  }
  func.func @transform_4(%arg0: i32, %arg1: i32) -> (i32, i32) {
    %c0_i32 = arith.constant 0 : i32
    %c0_i32_0 = arith.constant 0 : i32
    %c0_i32_1 = arith.constant 0 : i32
    return %c0_i32, %c0_i32_0 : i32, i32
  }
  func.func @transform_5(%arg0: i32, %arg1: i32) -> (i32, i32) {
    %c0_i32 = arith.constant 0 : i32
    %c0_i32_0 = arith.constant 0 : i32
    return %arg0, %c0_i32 : i32, i32
  }
}

</mosaic_0001>

<bundles_post_ra>
// kernel: tpu_custom_call.1
= control target key start
LH: loop header
LB: loop body
LE: loop exit
PB: predicated region body
PF: predicated region fallthrough
CT: control target
= control target key end

     0   :  { %10 = vsyncpa [#allocation4], 0  ;;  %s1049_s0 = inlined_call_operand.hbm [shape: f32[16,32], index: 0, kind: input, shape index: {}]   ;;  %s1050_s1 = inlined_call_operand.hbm [shape: f32[32,64], index: 1, kind: input, shape index: {}]   ;;  %s1051_s2 = inlined_call_operand.vmem [shape: f32[1,64], index: 2, kind: input, shape index: {}]   ;;  %s1052_s3 = inlined_call_operand.hbm [shape: f32[64,128], index: 3, kind: input, shape index: {}]   ;;  %s1053_s4 = inlined_call_operand.vmem [shape: f32[1,128], index: 4, kind: input, shape index: {}]   ;;  %s1054_s5 = inlined_call_operand.hbm [shape: f32[16,128], index: 5, kind: output, shape index: {}]  }
   0x1   :  { %12 = vsyncpa [#allocation4 + $0x1], 0 }
   0x2   :  { %13 = vsyncpa [#allocation7], 0 }
   0x3   :  { %14 = vsyncpa [#allocation5], 0 }
   0x4   :  { %16 = vsyncpa [#allocation5 + $0x1], 0  ;;  %s895_s18 = smov 0   ;;  %s897_s19 = smov 0  }
   0x5   :  { %s899_s20 = smov 0   ;;  %s901_s21 = smov 0  }
   0x6   :  { %s903_s22 = smov 0   ;;  %s905_s23 = smov 0  }
   0x7 LB: > { %s573_s24 = sadd.s32 4294967295, %s859_s23   ;;  %p575_p0 = scmp.ge.s32.totalorder %s859_s23, 1  ;;  %s859_s23 = sphi %s905_s23, %s22_s23   ;;  %s855_s22 = sphi %s903_s22, %s1064_s22   ;;  %s851_s21 = sphi %s901_s21, %s1063_s21   ;;  %s847_s20 = sphi %s899_s20, %s1062_s20   ;;  %s843_s19 = sphi %s897_s19, %s1061_s19   ;;  %s839_s18 = sphi %s895_s18, %s1060_s18  }
   0x8   : > { %p929_p1 = scmp.eq.s32.totalorder %s573_s24, 0  ;;  %p190_p2 = scmp.lt.s32.totalorder %s859_s23, 3 }
   0x9   : > { %s203_s28 = sshll.u32 %s1050_s1, 4  ;;  %s861_s30 = smov [#allocation6]   ;;  %s204_s28 = int_to_ptr.hbm [resolvable:$true] %s203_s28 }
   0xa   : > { %p937_p3 = pnand %p575_p0, %p190_p2  ;;  %s205_s6 = sshll.u32 %s861_s30, 4  ;;  %s206_s6 = int_to_ptr.vmem [resolvable:$true] %s205_s6 }
   0xb   : > { %p579_p6 = scmp.ge.s32.totalorder %s859_s23, 2  ;;  %s226_s9 = sshll.u32 %s1052_s3, 4  ;;  %s227_s9 = int_to_ptr.hbm [resolvable:$true] %s226_s9 }
   0xc   : > { %p606_p4 = pneg %p937_p3  ;;  %s862_s10 = smov 128  }
   0xd   : > { %s863_s11 = smov 8   ;;  %s864_s12 = smov [#allocation8]  }
   0xe   : > { %p607_p5 = pnand %p606_p4, %p929_p1  ;;  %s228_s13 = sshll.u32 %s864_s12, 4  ;;  %s229_s13 = int_to_ptr.vmem [resolvable:$true] %s228_s13 }
   0xf   : > { %s34_s14 = sadd.s32 1, %s855_s22  ;;  %s574_s15 = sadd.s32 4294967294, %s859_s23  }
  0x10   : > { %609 = dma.hbm_to_vmem [thread:$0]  (!%p607_p5), %s204_s28, 512, %s206_s6, [#allocation7], %s862_s10, %s862_s10, %s863_s11  }
  0x11   : > { %612 = dma.hbm_to_vmem [thread:$0]  (!%p607_p5), %s227_s9, 1024, %s229_s13, [#allocation7], %s862_s10, %s862_s10, %s863_s11  }
  0x12   : > { %p36_p7 = scmp.ge.s32.totalorder %s34_s14, 2  ;;  %s41_s16 = sadd.s32 1, %s847_s20 }
  0x13   : > { %p48_p8 = scmp.ne.s32.totalorder %s847_s20, %s843_s19  ;;  %p49_p9 = scmp.eq.s32.totalorder %s859_s23, 0 }
  0x14   : > { %s1066_s14 = smov (%p36_p7, %s34_s14), 0  ;;  %p54_p10 = scmp.ne.s32.totalorder %s843_s19, %s839_s18 }
  0x15   : > { %s38_s17 = ssub.s32 %s855_s22, %s1066_s14  ;;  %p177_p11 = scmp.eq.s32.totalorder %s573_s24, 1 }
  0x16   : > { %p39_p12 = scmp.eq.s32.totalorder %s38_s17, 0  ;;  %p965_p13 = por %p929_p1, %p54_p10 }
  0x17   : > { %p969_p0 = por %p177_p11, %p48_p8  ;;  %p183_p2 = scmp.eq.s32.totalorder %s574_s15, 1 }
  0x18   : > { %s974_s28 = scalar_select %p39_p12, %s847_s20, %s41_s16  }
  0x19   : > { %p50_p4 = por %p49_p9, %p48_p8  ;;  %p976_p5 = por %p183_p2, %p54_p10 }
  0x1a   : > { %s245_s6 = sand.u32 1, %s847_s20   ;;  %s581_s24 = sshll.u32 %s855_s22, 3 }
  0x1b   : > { %p623_p7 = scmp.lt.s32.totalorder %s859_s23, 2  ;;  %s580_s7 = sshll.u32 %s245_s6, 3 }
  0x1c   : > { %s253_s10 = scalar_lea.hbm %s1049_s0, %s581_s24  ;;  %s249_s12 = scalar_lea.vmem [#allocation3], %s580_s7 }
  0x1d   : > { %s255_s11 = sshll.u32 %s253_s10, 4  ;;  %s257_s13 = sshll.u32 %s249_s12, 4  ;;  %s256_s11 = int_to_ptr.hbm [resolvable:$true] %s255_s11  ;;  %s258_s13 = int_to_ptr.vmem [resolvable:$true] %s257_s13 }
  0x1e   : > { %p614_p11 = pnand %p623_p7, %p50_p4  ;;  %s246_s15 = scalar_lea.sflag [#allocation4], %s245_s6 }
  0x1f   : > { %266 = sbr.rel (%p937_p3) target bundleno = 359 (0x167), region = 40  ;;  %s989_s16 = sand.u32 (!%p937_p3), 1, %s843_s19  }
  0x20   : > { %616 = dma.hbm_to_vmem [thread:$0]  (!%p614_p11), %s256_s11, 128, %s258_s13, %s246_s15  }
  0x21   : > { %s583_s17 = sshll.u32 (!%p937_p3), %s989_s16, 3  ;;  %s269_s24 = scalar_lea.sflag (!%p937_p3), [#allocation4], %s989_s16 }
  0x22   : > { %s272_s7 = scalar_lea.vmem (!%p937_p3), [#allocation3], %s583_s17 }
  0x24   : > { %826 = dma.done.wait (%p965_p13), %s269_s24, 128  }
  0x25   : > { %828 = vsyncadd (%p965_p13), %s269_s24, 4294967168 }
  0x26   : > { %830 = dma.done.wait (%p929_p1), [#allocation7], 1536  }
  0x27   : > { %832 = vsyncadd (%p929_p1), [#allocation7], 4294965760  ;;  %v326_v0 = vld [vmem:[#allocation6 + $0x18] sm:$0xff]  ;;  %v325_v1 = vld [vmem:[#allocation6 + $0x10] sm:$0xff]  ;;  %vm331_vm0 = vcmask 261120   ;;  %vm408_vm5 = vcmask 523264  }
  0x28   : > { %347 = vmatpush.msra.mxu0 %v326_v0  ;;  %v324_v2 = vld [vmem:[#allocation6 + $0x8] sm:$0xff]  ;;  %v323_v3 = vld [vmem:[#allocation6] sm:$0xff]  ;;  %v322_v4 = vld [vmem:[%s272_s7] sm:$0xff]  ;;  %s591_s25 = sshll.u32 %s851_s21, 3  ;;  %s312_s12 = scalar_lea.vmem [#allocation9], %s583_s17 }
  0x29   : > { %v679_v5 = vld [vmem:[%s1051_s2] ss:$0 sm:$0xff]  ;;  %v407_v13 = vld [vmem:[#allocation8 + $0x38] sm:$0xff]  ;;  %v405_v19 = vld [vmem:[#allocation8 + $0x28] sm:$0xff]  ;;  %s455_s9 = scalar_lea.hbm %s1054_s5, %s591_s25  ;;  %s457_s13 = sshll.u32 %s312_s12, 4  ;;  %s458_s13 = int_to_ptr.vmem [resolvable:$true] %s457_s13 }
  0x2a   : > { %348 = vmatpush.msra.mxu0 %v325_v1  ;;  %420 = vmatpush.msra.mxu1 %v407_v13  ;;  %v406_v16 = vld [vmem:[#allocation8 + $0x30] sm:$0xff]  ;;  %v404_v21 = vld [vmem:[#allocation8 + $0x20] sm:$0xff]  ;;  %v403_v24 = vld [vmem:[#allocation8 + $0x18] sm:$0xff]  ;;  %s459_s15 = sshll.u32 %s455_s9, 4  ;;  %s445_s24 = scalar_lea.sflag [#allocation5], %s989_s16  ;;  %s460_s15 = int_to_ptr.hbm [resolvable:$true] %s459_s15 }
  0x2b   : > { %v402_v26 = vld [vmem:[#allocation8 + $0x10] sm:$0xff]  ;;  %v401_v29 = vld [vmem:[#allocation8 + $0x8] sm:$0xff]  ;;  %v400_v30 = vld [vmem:[#allocation8] sm:$0xff]  ;;  %s787_s21 = sshra.s32 %s460_s15, 4  ;;  %s793_s25 = scalar_lea.hbm %s1054_s5, 16  ;;  %s788_s21 = int_to_ptr.hbm [resolvable:$true] %s787_s21 }
  0x2c   : > { %349 = vmatpush.msra.mxu0 %v324_v2  ;;  %421 = vmatpush.msra.mxu1 %v406_v16  ;;  %v680_v55 = vld [vmem:[%s1053_s4] ss:$0 sm:$0xff]  ;;  %s789_s7 = scalar_lea.hbm %s788_s21, 8  ;;  %p794_p9 = scmp.lt.s32.totalorder %s788_s21, %s1054_s5 }
  0x2d   : > { %p790_p1 = scmp.ne.s32.totalorder %s788_s21, %s789_s7  ;;  %p795_p10 = scmp.lt.s32.totalorder %s793_s25, %s789_s7 }
  0x2e   : > { %350 = vmatpush.msra.mxu0 %v323_v3  ;;  %422 = vmatpush.msra.mxu1 %v405_v19 }
  0x2f   : > { %587 = vmatmul.msk.f32.vlgmr.msra.gmra.mxu0 %vm331_vm0, %v322_v4  ;;  %p791_p3 = pnand %p790_p1, %p969_p0  ;;  %p796_p12 = por %p795_p10, %p794_p9 }
  0x30   : > { %423 = vmatpush.msra.mxu1 %v404_v21 }
  0x31   : > { %p792_p8 = pneg %p791_p3 }
  0x32   : > { %424 = vmatpush.msra.mxu1 %v403_v24 }
  0x33   : > { %p797_p13 = pnand %p796_p12, %p792_p8 }
  0x34   : > { %425 = vmatpush.msra.mxu1 %v402_v26 }
  0x36   : > { %426 = vmatpush.msra.mxu1 %v401_v29 }
  0x38   : > { %427 = vmatpush.msra.mxu1 %v400_v30 }
  0xac   : > { %v352_v6 = vpop.f32.mrf.mxu0 }
  0xad   : > { %v353_v7 = vadd.f32 %v679_v5, %v352_v6 }
  0xaf   : > { %v355_v8 = vmul.f32 0.70710677, %v353_v7 }
  0xb1   : > { %v356_v9 = vmul.f32 %v355_v8, %v355_v8 }
  0xb3   : > { %v357_v10 = vmin.f32 %v356_v9, 16.0 }
  0xb5   : > { %v358_v11 = vmul.f32 2.1237322e-06, %v357_v10  ;;  %v369_v12 = vmul.f32 3.8918573e-05, %v357_v10 }
  0xb7   : > { %v359_v14 = vadd.f32 0.00028619796, %v358_v11  ;;  %v370_v15 = vadd.f32 0.001143296, %v369_v12 }
  0xb9   : > { %v360_v17 = vmul.f32 %v359_v14, %v357_v10  ;;  %v371_v18 = vmul.f32 %v370_v15, %v357_v10 }
  0xbb   : > { %v372_v20 = vadd.f32 0.014752088, %v371_v18  ;;  %v361_v22 = vadd.f32 0.0036580483, %v360_v17 }
  0xbd   : > { %v373_v23 = vmul.f32 %v372_v20, %v357_v10  ;;  %v362_v27 = vmul.f32 %v361_v22, %v357_v10 }
  0xbf   : > { %v374_v25 = vadd.f32 0.112945676, %v373_v23  ;;  %v363_v32 = vadd.f32 0.05243302, %v362_v27 }
  0xc1   : > { %v375_v28 = vmul.f32 %v374_v25, %v357_v10  ;;  %v364_v35 = vmul.f32 %v363_v32, %v357_v10 }
  0xc3   : > { %v376_v31 = vadd.f32 0.4994258, %v375_v28  ;;  %v365_v36 = vadd.f32 0.18741608, %v364_v35 }
  0xc5   : > { %v377_v33 = vmul.f32 %v376_v31, %v357_v10  ;;  %v366_v38 = vmul.f32 %v365_v36, %v357_v10 }
  0xc7   : > { %v378_v34 = vadd.f32 1.0, %v377_v33  ;;  %v367_v42 = vadd.f32 1.1283791, %v366_v38 }
  0xc9   : > { %681 = vrcp.f32 %v378_v34  ;;  %v390_v41 = vand.u32 2147483648, %v378_v34  ;;  %v388_v44 = vand.u32 2147483647, %v378_v34  ;;  %vm384_vm2 = vweird.f32 %v378_v34 }
  0xca   : > { %v368_v47 = vmul.f32 %v367_v42, %v355_v8 }
  0xcb   : > { %v391_v46 = vor.u32 1.1754944e-38, %v390_v41  ;;  %vm389_vm4 = vcmp.eq.f32.partialorder %v388_v44, 8.507059e+37 }
  0xcf   : > { %v682_v37 = vpop.eup %681 }
  0xd0   : > { %v380_v39 = vmul.f32 %v682_v37, %v378_v34  ;;  %vm385_vm1 = vweird.f32 %v682_v37 }
  0xd1   : > { %vm386_vm3 = vmor %vm384_vm2, %vm385_vm1 }
  0xd2   : > { %v381_v40 = vsub.f32 1.0, %v380_v39 }
  0xd4   : > { %v382_v43 = vmul.f32 %v682_v37, %v381_v40 }
  0xd6   : > { %v383_v45 = vadd.f32 %v682_v37, %v382_v43 }
  0xd8   : > { %v387_v48 = vsel %vm386_vm3, %v682_v37, %v383_v45 }
  0xd9   : > { %v392_v49 = vsel %vm389_vm4, %v391_v46, %v387_v48 }
  0xda   : > { %v393_v50 = vmul.f32 %v392_v49, %v368_v47 }
  0xdc   : > { %v588_v51 = vclamps-f32 %v393_v50, 1.0 }
  0xde   : > { %v396_v52 = vadd.f32 1.0, %v588_v51 }
  0xe0   : > { %v397_v53 = vmul.f32 0.5, %v396_v52 }
  0xe2   : > { %v398_v54 = vmul.f32 %v397_v53, %v353_v7 }
  0xe4   : > { %589 = vmatmul.msk.f32.vlgmr.msra.gmra.mxu1 %vm408_vm5, %v398_v54 }
 0x161   : > { %v429_v56 = vpop.f32.mrf.mxu1 }
 0x162   : > { %v442_v57 = vadd.f32 %v680_v55, %v429_v56 }
 0x164   : > { %443 = vst [vmem:[%s312_s12] sm:$0xff] %v442_v57 }
 0x165   : > { %800 = shalt.err (!%p797_p13)
}
 0x166   : > { %604 = dma.vmem_to_hbm [thread:$0]  (%p969_p0), %s458_s13, 128, %s460_s15, %s445_s24  }
 0x167 PF: > { %s471_s16 = sand.u32 1, %s839_s18   ;;  %p618_p2 = pnand %p579_p6, %p976_p5 }
 0x168   : > { %s472_s8 = scalar_lea.sflag [#allocation5], %s471_s16 }
 0x169   : > { %p619_p4 = pneg %p618_p2 }
 0x16b   : > { %834 = dma.done.wait (%p619_p4), %s472_s8, 128  }
 0x16c   : > { %836 = vsyncadd (%p619_p4), %s472_s8, 4294967168  ;;  %s22_s23 = sadd.s32 1, %s859_s23   ;;  %s1060_s18 = smov %s843_s19 }
 0x16d   : > { %p19_p7 = scmp.ge.s32.totalorder %s22_s23, 4   ;;  %s1061_s19 = smov %s847_s20 }
 0x16e   : > { %s1062_s20 = smov %s974_s28  ;;  %s1063_s21 = smov %s855_s22 }
 0x16f   : > { %s1064_s22 = smov %s1066_s14  ;;  %21 = sbr.rel (!%p19_p7) target bundleno = 7 (0x7), region = 106 }
 0x174   :  { %478 = vsyncpa [#allocation4], 1 }
 0x175   :  { %480 = vsyncpa [#allocation4 + $0x1], 1 }
 0x176   :  { %481 = vsyncpa [#allocation7], 1 }
 0x177   :  { %482 = vsyncpa [#allocation5], 1 }
 0x178   :  { %484 = vsyncpa [#allocation5 + $0x1], 1 }

</bundles_post_ra>
